<compile_context>
chip_gen: v5e
topology: v5e:2x2
jax: 0.10.0
libtpu: 0.0.40
codegen_flags: <defaults>
</compile_context>

<pallas_src>
import functools
import math

import jax
import jax.numpy as jnp
from jax.experimental import pallas as pl
from jax.experimental.pallas import tpu as pltpu


def _round_up(x, m):
    return (x + m - 1) // m * m


# Generation-safe budgets (bytes).  v7x has the smallest VMEM (64 MiB physical,
# 32 MiB default scoped); size blocks for that and raise the scoped limit
# explicitly (v5e's default scoped limit is only 16 MiB).
_FUSED_SLAB_BYTES = 6 * 1024 * 1024   # per-image f32 slab; ~4x w/ dbl-buffering
_TILE_BLOCK_BYTES = 4 * 1024 * 1024   # per spatial block in the tiled fallback
_VMEM_LIMIT_BYTES = 48 * 1024 * 1024


# ----------------------------------------------------------------------------
# Fused kernel: pool + fc1 + ReLU + fc2 + sigmoid + scale, one HBM read of x.
# ----------------------------------------------------------------------------
def _se_fused_kernel(x_ref, w1_ref, w2_ref, o_ref, *, inv_hw):
    x = x_ref[0]                                                     # [C, HW]
    pooled = jnp.sum(x.astype(jnp.float32), axis=1, keepdims=True) * inv_hw
    hid = jnp.maximum(
        jnp.dot(w1_ref[...], pooled, preferred_element_type=jnp.float32), 0.0)
    gate = jax.nn.sigmoid(
        jnp.dot(w2_ref[...], hid, preferred_element_type=jnp.float32))  # [C,1]
    o_ref[0] = x * gate.astype(x.dtype)


# ----------------------------------------------------------------------------
# Tiled fallback kernel 1: global-average-pool + fc1 -> ReLU -> fc2 -> sigmoid
# ----------------------------------------------------------------------------
def _se_gate_kernel(x_ref, w1_ref, w2_ref, gate_ref, acc_ref, *, inv_hw):
    s = pl.program_id(1)

    @pl.when(s == 0)
    def _():
        acc_ref[...] = jnp.zeros_like(acc_ref)

    x = x_ref[0].astype(jnp.float32)                                 # [C, T]
    t = x.shape[-1]
    # Lane-dense accumulation: full-width [C,128] VALU adds every spatial step;
    # the single cross-lane (XLU) reduce is deferred to the final step.
    partial = x[:, 0:128]
    for k in range(1, t // 128):
        partial = partial + x[:, k * 128:(k + 1) * 128]
    acc_ref[...] += partial

    @pl.when(s == pl.num_programs(1) - 1)
    def _():
        pooled = jnp.sum(acc_ref[...], axis=1, keepdims=True) * inv_hw  # [C,1]
        hid = jnp.maximum(
            jnp.dot(w1_ref[...], pooled, preferred_element_type=jnp.float32),
            0.0)
        gate = jax.nn.sigmoid(
            jnp.dot(w2_ref[...], hid, preferred_element_type=jnp.float32))
        gate_ref[0] = gate.astype(gate_ref.dtype)


# ----------------------------------------------------------------------------
# Tiled fallback kernel 2: out = x * gate (gate broadcast along lanes)
# ----------------------------------------------------------------------------
def _se_scale_kernel(x_ref, gate_ref, o_ref):
    x = x_ref[0]
    o_ref[0] = x * gate_ref[0].astype(x.dtype)


# ----------------------------------------------------------------------------
# Spatial tile selection for the tiled fallback
# ----------------------------------------------------------------------------
def _pick_hw_tile(hw, c):
    """Pick a lane-dense (multiple-of-128) spatial tile within the per-block
    budget.  Prefer the largest tile that divides hw exactly (no padding);
    otherwise minimize padding, allowing larger tiles if they waste <~1.5%."""
    max_lanes = max(128, (_TILE_BLOCK_BYTES // (4 * c)) // 128 * 128)
    cands = list(range(128, max_lanes + 1, 128))
    exact = [t for t in cands if hw % t == 0]
    if exact:
        return max(exact), hw
    min_pad = min(_round_up(hw, t) - hw for t in cands)
    tol = max(min_pad, hw // 64)
    t = max(t for t in cands if (_round_up(hw, t) - hw) <= tol)
    return t, _round_up(hw, t)


# ----------------------------------------------------------------------------
# SEModule forward
# ----------------------------------------------------------------------------
@functools.partial(jax.jit, static_argnames=("force_tiled",))
def se_module_forward(x_nchw, w_fc1, w_fc2, force_tiled=False):
    """x_nchw: [N, C, H, W]
       w_fc1:  [C//r, C, 1, 1]  (PyTorch Conv2d weight, bias=False)
       w_fc2:  [C, C//r, 1, 1]
    """
    n, c, h, w = x_nchw.shape
    mid = w_fc1.shape[0]
    hw = h * w

    x = x_nchw.reshape(n, c, hw)           # NCHW stays; free, contiguous reshape
    out_dtype = x.dtype

    # Pad the squeezed channel count to a sublane multiple.  Zero rows of fc1
    # feed ReLU(0)=0 into zero columns of fc2 -> numerically inert.
    mid_p = max(8, _round_up(mid, 8))
    w1 = jnp.zeros((mid_p, c), jnp.float32).at[:mid].set(
        w_fc1.reshape(mid, c).astype(jnp.float32))
    w2 = jnp.zeros((c, mid_p), jnp.float32).at[:, :mid].set(
        w_fc2.reshape(c, mid).astype(jnp.float32))

    slab_f32_bytes = c * hw * 4

    # -------------------- Fused single-pass path (common case) --------------
    if (not force_tiled) and slab_f32_bytes <= _FUSED_SLAB_BYTES:
        y = pl.pallas_call(
            functools.partial(_se_fused_kernel, inv_hw=1.0 / hw),
            out_shape=jax.ShapeDtypeStruct((n, c, hw), out_dtype),
            grid=(n,),
            in_specs=[
                pl.BlockSpec((1, c, hw), lambda b: (b, 0, 0)),
                pl.BlockSpec((mid_p, c), lambda b: (0, 0)),
                pl.BlockSpec((c, mid_p), lambda b: (0, 0)),
            ],
            out_specs=pl.BlockSpec((1, c, hw), lambda b: (b, 0, 0)),
            compiler_params=pltpu.CompilerParams(
                dimension_semantics=("parallel",),
                vmem_limit_bytes=_VMEM_LIMIT_BYTES),
        )(x, w1, w2)
        return y.reshape(n, c, h, w)

    # -------------------- Tiled fallback (oversized per-image slab) ---------
    hw_tile, hw_pad = _pick_hw_tile(hw, c)
    if hw_pad != hw:
        # Rare path (no 128-multiple divisor within budget); zeros are inert
        # for the pooled sum since inv_hw uses the true hw.
        x = jnp.pad(x, ((0, 0), (0, 0), (0, hw_pad - hw)))
    s_steps = hw_pad // hw_tile

    # Kernel 1: pooled mean + fc1/ReLU/fc2/sigmoid -> gate [N, C, 1]
    gate = pl.pallas_call(
        functools.partial(_se_gate_kernel, inv_hw=1.0 / hw),
        out_shape=jax.ShapeDtypeStruct((n, c, 1), jnp.float32),
        grid=(n, s_steps),
        in_specs=[
            pl.BlockSpec((1, c, hw_tile), lambda b, s: (b, 0, s)),
            pl.BlockSpec((mid_p, c), lambda b, s: (0, 0)),
            pl.BlockSpec((c, mid_p), lambda b, s: (0, 0)),
        ],
        out_specs=pl.BlockSpec((1, c, 1), lambda b, s: (b, 0, 0)),
        scratch_shapes=[pltpu.VMEM((c, 128), jnp.float32)],
        compiler_params=pltpu.CompilerParams(
            dimension_semantics=("parallel", "arbitrary"),
            vmem_limit_bytes=_VMEM_LIMIT_BYTES),
    )(x, w1, w2)

    # Kernel 2: out = x * gate (broadcast over H*W)
    y = pl.pallas_call(
        _se_scale_kernel,
        out_shape=jax.ShapeDtypeStruct((n, c, hw_pad), out_dtype),
        grid=(n, s_steps),
        in_specs=[
            pl.BlockSpec((1, c, hw_tile), lambda b, s: (b, 0, s)),
            pl.BlockSpec((1, c, 1), lambda b, s: (b, 0, 0)),
        ],
        out_specs=pl.BlockSpec((1, c, hw_tile), lambda b, s: (b, 0, s)),
        compiler_params=pltpu.CompilerParams(
            dimension_semantics=("parallel", "parallel"),
            vmem_limit_bytes=_VMEM_LIMIT_BYTES),
    )(x, gate)

    if hw_pad != hw:
        y = y[:, :, :hw]
    return y.reshape(n, c, h, w)


# ----------------------------------------------------------------------------
# Demo / self-check
# ----------------------------------------------------------------------------
if __name__ == "__main__":
    key = jax.random.PRNGKey(0)
    kx, k1, k2 = jax.random.split(key, 3)

    # Small, SEModule-consistent shapes: batch=2, channels=64, reduction=16,
    # spatial 16x16  ->  mid = 4.
    n, c, h, w = 2, 64, 16, 16
    reduction = 16
    mid = c // reduction

    x = jax.random.normal(kx, (n, c, h, w), dtype=jnp.float32)
    w_fc1 = jax.random.normal(k1, (mid, c, 1, 1), jnp.float32) / math.sqrt(c)
    w_fc2 = jax.random.normal(k2, (c, mid, 1, 1), jnp.float32) / math.sqrt(mid)

    # Pure-JAX reference (same semantics as the PyTorch module).
    pooled = jnp.mean(x, axis=(2, 3))                                 # [N, C]
    hid = jnp.maximum(pooled @ w_fc1.reshape(mid, c).T, 0.0)          # [N, mid]
    g = jax.nn.sigmoid(hid @ w_fc2.reshape(c, mid).T)                 # [N, C]
    ref = x * g[:, :, None, None]

    # Fused single-pass path (the one real SE shapes take).
    out_fused = jax.block_until_ready(se_module_forward(x, w_fc1, w_fc2))
    assert out_fused.shape == (n, c, h, w), out_fused.shape
    err_fused = float(jnp.max(jnp.abs(out_fused - ref)))
    assert err_fused < 1e-4, f"fused path max abs err {err_fused}"

    # Tiled fallback path (exercised here via the static flag for coverage).
    out_tiled = jax.block_until_ready(
        se_module_forward(x, w_fc1, w_fc2, force_tiled=True))
    err_tiled = float(jnp.max(jnp.abs(out_tiled - ref)))
    assert err_tiled < 1e-4, f"tiled path max abs err {err_tiled}"

    print("KERNEL_OK")
</pallas_src>

<mosaic_0001>
module attributes {stable_mosaic.version = 11 : i64} {
  func.func @_se_fused_kernel(%arg0: i32, %arg1: memref<1x64x256xf32, #tpu.memory_space<vmem>>, %arg2: memref<8x64xf32, #tpu.memory_space<vmem>>, %arg3: memref<64x8xf32, #tpu.memory_space<vmem>>, %arg4: memref<1x64x256xf32, #tpu.memory_space<vmem>>) attributes {dimension_semantics = [#tpu.dimension_semantics<parallel>], iteration_bounds = array<i64: 2>, scalar_prefetch = 0 : i64, scratch_operands = 0 : i64, tpu.core_type = #tpu.core_type<tc>, window_params = [{transform_indices = @transform_0, window_bounds = array<i64: 1, 64, 256>}, {pipeline_mode = #tpu.pipeline_mode<synchronous>, transform_indices = @transform_1, window_bounds = array<i64: 8, 64>}, {pipeline_mode = #tpu.pipeline_mode<synchronous>, transform_indices = @transform_2, window_bounds = array<i64: 64, 8>}, {transform_indices = @transform_3, window_bounds = array<i64: 1, 64, 256>}]} {
    %c0 = arith.constant 0 : index
    %c0_0 = arith.constant 0 : index
    %c0_1 = arith.constant 0 : index
    %0 = vector.load %arg1[%c0, %c0_0, %c0_1] : memref<1x64x256xf32, #tpu.memory_space<vmem>>, vector<1x64x256xf32>
    %1 = vector.shape_cast %0 : vector<1x64x256xf32> to vector<64x256xf32>
    %cst = arith.constant dense<0.000000e+00> : vector<64xf32>
    %2 = vector.multi_reduction <add>, %1, %cst [1] : vector<64x256xf32> to vector<64xf32>
    %3 = vector.shape_cast %2 : vector<64xf32> to vector<64x1xf32>
    %cst_2 = arith.constant 3.906250e-03 : f32
    %4 = vector.broadcast %cst_2 : f32 to vector<64x1xf32>
    %5 = arith.mulf %3, %4 : vector<64x1xf32>
    %c0_3 = arith.constant 0 : index
    %c0_4 = arith.constant 0 : index
    %6 = vector.load %arg2[%c0_3, %c0_4] : memref<8x64xf32, #tpu.memory_space<vmem>>, vector<8x64xf32>
    %cst_5 = arith.constant dense<0.000000e+00> : vector<8x1xf32>
    %7 = tpu.matmul %6, %5, %cst_5 {dimension_numbers = #tpu.dot_dimension_numbers<[1], [0], [0], [1], [0, 0, 1, 1], [], []>} : vector<8x64xf32>, vector<64x1xf32>, vector<8x1xf32> -> vector<8x1xf32>
    %cst_6 = arith.constant 0.000000e+00 : f32
    %8 = vector.broadcast %cst_6 : f32 to vector<8x1xf32>
    %9 = arith.maximumf %7, %8 : vector<8x1xf32>
    %c0_7 = arith.constant 0 : index
    %c0_8 = arith.constant 0 : index
    %10 = vector.load %arg3[%c0_7, %c0_8] : memref<64x8xf32, #tpu.memory_space<vmem>>, vector<64x8xf32>
    %cst_9 = arith.constant dense<0.000000e+00> : vector<64x1xf32>
    %11 = tpu.matmul %10, %9, %cst_9 {dimension_numbers = #tpu.dot_dimension_numbers<[1], [0], [0], [1], [0, 0, 1, 1], [], []>} : vector<64x8xf32>, vector<8x1xf32>, vector<64x1xf32> -> vector<64x1xf32>
    %12 = arith.negf %11 : vector<64x1xf32>
    %13 = math.exp %12 : vector<64x1xf32>
    %cst_10 = arith.constant 1.000000e+00 : f32
    %14 = vector.broadcast %cst_10 : f32 to vector<64x1xf32>
    %15 = arith.addf %14, %13 : vector<64x1xf32>
    %16 = arith.divf %14, %15 : vector<64x1xf32>
    %17 = vector.broadcast %16 : vector<64x1xf32> to vector<64x256xf32>
    %18 = arith.mulf %1, %17 : vector<64x256xf32>
    %c0_11 = arith.constant 0 : index
    %c0_12 = arith.constant 0 : index
    %c0_13 = arith.constant 0 : index
    %19 = vector.load %arg4[%c0_11, %c0_12, %c0_13] : memref<1x64x256xf32, #tpu.memory_space<vmem>>, vector<1x64x256xf32>
    %20 = vector.shape_cast %19 : vector<1x64x256xf32> to vector<64x256xf32>
    %21 = vector.shape_cast %18 : vector<64x256xf32> to vector<1x64x256xf32>
    tpu.vector_store %arg4[%c0_11, %c0_12, %c0_13], %21 {strides = array<i32>} : memref<1x64x256xf32, #tpu.memory_space<vmem>>, vector<1x64x256xf32>,
    return
  }
  func.func @transform_0(%arg0: i32) -> (i32, i32, i32) {
    %c0_i32 = arith.constant 0 : i32
    %c0_i32_0 = arith.constant 0 : i32
    %c0_i32_1 = arith.constant 0 : i32
    return %arg0, %c0_i32, %c0_i32_0 : i32, i32, i32
  }
  func.func @transform_1(%arg0: i32) -> (i32, i32) {
    %c0_i32 = arith.constant 0 : i32
    %c0_i32_0 = arith.constant 0 : i32
    %c0_i32_1 = arith.constant 0 : i32
    return %c0_i32, %c0_i32_0 : i32, i32
  }
  func.func @transform_2(%arg0: i32) -> (i32, i32) {
    %c0_i32 = arith.constant 0 : i32
    %c0_i32_0 = arith.constant 0 : i32
    %c0_i32_1 = arith.constant 0 : i32
    return %c0_i32, %c0_i32_0 : i32, i32
  }
  func.func @transform_3(%arg0: i32) -> (i32, i32, i32) {
    %c0_i32 = arith.constant 0 : i32
    %c0_i32_0 = arith.constant 0 : i32
    %c0_i32_1 = arith.constant 0 : i32
    return %arg0, %c0_i32, %c0_i32_0 : i32, i32, i32
  }
}

</mosaic_0001>

<bundles_post_ra>
// kernel: se_module_forward.1
= control target key start
LH: loop header
LB: loop body
LE: loop exit
PB: predicated region body
PF: predicated region fallthrough
CT: control target
= control target key end

     0   :  { %s703_s12 = smov 0   ;;  %s908_s0 = inlined_call_operand.vmem [shape: f32[2,64,256], index: 0, kind: input, shape index: {}]   ;;  %s909_s1 = inlined_call_operand.vmem [shape: f32[8,64], index: 1, kind: input, shape index: {}]   ;;  %s910_s2 = inlined_call_operand.vmem [shape: f32[64,8], index: 2, kind: input, shape index: {}]   ;;  %s911_s3 = inlined_call_operand.vmem [shape: f32[2,64,256], index: 3, kind: output, shape index: {}]  }
   0x1 LB: > { %s598_s13 = sadd.s32 4294967295, %s680_s12   ;;  %p602_p0 = scmp.ge.s32.totalorder %s680_s12, 1  ;;  %s680_s12 = sphi %s703_s12, %s13_s12  }
   0x2   : > { %p137_p1 = scmp.lt.s32.totalorder %s680_s12, 3 }
   0x4   : > { %p138_p2 = pnand %p602_p0, %p137_p1 }
   0x5   : > { %p161_p3 = scmp.lt.s32.totalorder (!%p138_p2), %s598_s13, 1 }
   0x6   : > { %141 = sbr.rel (%p138_p2) target bundleno = 592 (0x250), region = 32 }
   0xb   : > { %s915_s13 = smov (!%p161_p3, %s598_s13), 1  ;;  %v219_v40 = vld [vmem:[%s909_s1] sm:$0xff]  ;;  %vm220_vm0 = vcmask 523264   ;;  %vm253_vm1 = vcmask 64512   ;;  %v248_v44 = vld [vmem:[%s910_s2 + $0x18] sm:$0xff]  ;;  %v251_v45 = vld [vmem:[%s910_s2 + $0x30] sm:$0xff] }
   0xc   : > { %s626_s14 = sshll.u32 %s915_s13, 7  ;;  %v245_v43 = vld [vmem:[%s910_s2] sm:$0xff]  ;;  %v246_v46 = vld [vmem:[%s910_s2 + $0x8] sm:$0xff]  ;;  %v252_v48 = vld [vmem:[%s910_s2 + $0x38] sm:$0xff]  ;;  %v682_v51 = vmov 0  }
   0xd   : > { %s165_s17 = scalar_lea.vmem %s908_s0, %s626_s14  ;;  %v249_v47 = vld [vmem:[%s910_s2 + $0x20] sm:$0xff]  ;;  %v247_v49 = vld [vmem:[%s910_s2 + $0x10] sm:$0xff]  ;;  %v250_v50 = vld [vmem:[%s910_s2 + $0x28] sm:$0xff]  ;;  %639 = vset.pattern.permute.xlu2 %v682_v51  ;;  %640 = vset.pattern.permute.xlu0 %v682_v51  ;;  %s871_s11 = scalar_lea.vmem %s911_s3, %s626_s14 }
   0xe   : > { %v719_v0 = vld [vmem:[%s165_s17 + $0x70] sm:$0xff]  ;;  %v721_v1 = vld [vmem:[%s165_s17 + $0x78] sm:$0xff]  ;;  %v737_v9 = vld [vmem:[%s165_s17 + $0x60] sm:$0xff]  ;;  %641 = vset.pattern.permute.xlu1 %v682_v51 }
   0xf   : > { %v723_v2 = vld [vmem:[%s165_s17 + $0x50] sm:$0xff]  ;;  %v208_v3 = vadd.f32 %v721_v1, %v719_v0  ;;  %v727_v4 = vld [vmem:[%s165_s17 + $0x58] sm:$0xff]  ;;  %v739_v10 = vld [vmem:[%s165_s17 + $0x68] sm:$0xff] }
  0x10   : > { %v202_v5 = vadd.f32 %v727_v4, %v723_v2  ;;  %v731_v6 = vld [vmem:[%s165_s17 + $0x30] sm:$0xff]  ;;  %v733_v7 = vld [vmem:[%s165_s17 + $0x38] sm:$0xff]  ;;  %v741_v11 = vld [vmem:[%s165_s17 + $0x40] sm:$0xff]  ;;  %v205_v15 = vadd.f32 %v739_v10, %v737_v9 }
  0x11   : > { %209 = vadd.xlane.f32.xlu0 %v208_v3  ;;  %v196_v8 = vadd.f32 %v733_v7, %v731_v6  ;;  %v743_v12 = vld [vmem:[%s165_s17 + $0x48] sm:$0xff]  ;;  %v745_v13 = vld [vmem:[%s165_s17 + $0x20] sm:$0xff]  ;;  %v755_v18 = vld [vmem:[%s165_s17 + $0x10] sm:$0xff] }
  0x12   : > { %203 = vadd.xlane.f32.xlu1 %v202_v5  ;;  %v747_v14 = vld [vmem:[%s165_s17 + $0x28] sm:$0xff]  ;;  %v199_v16 = vadd.f32 %v743_v12, %v741_v11  ;;  %v757_v19 = vld [vmem:[%s165_s17 + $0x18] sm:$0xff]  ;;  %v759_v20 = vld [vmem:[%s165_s17] sm:$0xff] }
  0x13   : > { %197 = vadd.xlane.f32.xlu2 %v196_v8  ;;  %v193_v17 = vadd.f32 %v747_v14, %v745_v13  ;;  %v761_v21 = vld [vmem:[%s165_s17 + $0x8] sm:$0xff]  ;;  %v190_v22 = vadd.f32 %v757_v19, %v755_v18 }
  0x14   : > { %v187_v23 = vadd.f32 %v761_v21, %v759_v20 }
  0x19   : > { %206 = vadd.xlane.f32.xlu0 %v205_v15 }
  0x1a   : > { %200 = vadd.xlane.f32.xlu1 %v199_v16 }
  0x1b   : > { %194 = vadd.xlane.f32.xlu2 %v193_v17 }
  0x21   : > { %191 = vadd.xlane.f32.xlu0 %v190_v22 }
  0x22   : > { %188 = vadd.xlane.f32.xlu1 %v187_v23 }
  0x84   : > { %v210_v24 = vpop.xlane.xlu0 %209 }
  0x85   : > { %v218_v25 = vmul.f32 0.00390625, %v210_v24  ;;  %v204_v26 = vpop.xlane.xlu1 %203 }
  0x86   : > { %v198_v27 = vpop.xlane.xlu2 %197  ;;  %v216_v31 = vmul.f32 0.00390625, %v204_v26 }
  0x87   : > { %232 = vmatpush.msra.mxu0 %v218_v25  ;;  %v214_v34 = vmul.f32 0.00390625, %v198_v27 }
  0x8c   : > { %v207_v28 = vpop.xlane.xlu0 %206 }
  0x8d   : > { %v217_v29 = vmul.f32 0.00390625, %v207_v28  ;;  %v201_v30 = vpop.xlane.xlu1 %200 }
  0x8e   : > { %v215_v32 = vmul.f32 0.00390625, %v201_v30  ;;  %v195_v33 = vpop.xlane.xlu2 %194 }
  0x8f   : > { %233 = vmatpush.msra.mxu0 %v217_v29  ;;  %v213_v35 = vmul.f32 0.00390625, %v195_v33 }
  0x91   : > { %234 = vmatpush.msra.mxu0 %v216_v31 }
  0x93   : > { %235 = vmatpush.msra.mxu0 %v215_v32 }
  0x94   : > { %v192_v36 = vpop.xlane.xlu0 %191 }
  0x95   : > { %236 = vmatpush.msra.mxu0 %v214_v34  ;;  %v212_v37 = vmul.f32 0.00390625, %v192_v36  ;;  %v189_v38 = vpop.xlane.xlu1 %188 }
  0x96   : > { %v211_v39 = vmul.f32 0.00390625, %v189_v38 }
  0x97   : > { %237 = vmatpush.msra.mxu0 %v213_v35 }
  0x99   : > { %238 = vmatpush.msra.mxu0 %v212_v37 }
  0x9b   : > { %239 = vmatpush.msra.mxu0 %v211_v39 }
  0x9c   : > { %607 = vmatmul.msk.f32.vlgmr.msra.gmra.mxu0 %vm220_vm0, %v219_v40 }
 0x119   : > { %v241_v41 = vpop.f32.mrf.mxu0 }
 0x11a   : > { %v244_v42 = vmax.f32 %v241_v41, 0.0 }
 0x11c   : > { %293 = vmatpush.msra.mxu1 %v244_v42  ;;  %628 = vmatpush.msra.mxu2 %v244_v42 }
 0x11d   : > { %629 = vmatpush.msra.mxu3 %v244_v42  ;;  %608 = vmatmul.msk.f32.vlgmr.msra.gmra.mxu1 %vm253_vm1, %v245_v43 }
 0x11e   : > { %611 = vmatmul.msk.f32.vlgmr.msra.gmra.mxu2 %vm253_vm1, %v248_v44  ;;  %614 = vmatmul.msk.f32.vlgmr.msra.gmra.mxu3 %vm253_vm1, %v251_v45 }
 0x125   : > { %609 = vmatmul.msk.f32.gmra.mxu1 %vm253_vm1, %v246_v46 }
 0x126   : > { %612 = vmatmul.msk.f32.gmra.mxu2 %vm253_vm1, %v249_v47  ;;  %615 = vmatmul.msk.f32.gmra.mxu3 %vm253_vm1, %v252_v48 }
 0x12d   : > { %610 = vmatmul.msk.f32.gmra.mxu1 %vm253_vm1, %v247_v49 }
 0x12e   : > { %613 = vmatmul.msk.f32.gmra.mxu2 %vm253_vm1, %v250_v50 }
 0x19a   : > { %v295_v52 = vpop.f32.mrf.mxu1 }
 0x19b   : > { %v616_v53 = vmul.f32 -1.442695, %v295_v52 }
 0x19d   : > { %642 = vpow2.f32 %v616_v53 }
 0x1a1   : > { %v304_v54 = vpop.f32.mrf.mxu2  ;;  %v313_v55 = vpop.f32.mrf.mxu3 }
 0x1a2   : > { %v619_v56 = vmul.f32 -1.442695, %v304_v54  ;;  %v298_v57 = vpop.f32.mrf.mxu1  ;;  %v622_v60 = vmul.f32 -1.442695, %v313_v55 }
 0x1a3   : > { %v643_v58 = vpop.eup %642  ;;  %v617_v59 = vmul.f32 -1.442695, %v298_v57 }
 0x1a4   : > { %v343_v61 = vadd.f32 1.0, %v643_v58  ;;  %644 = vpow2.f32 %v619_v56 }
 0x1a5   : > { %646 = vpow2.f32 %v617_v59 }
 0x1a6   : > { %648 = vrcp.f32 %v343_v61  ;;  %v362_v29 = vand.u32 2147483648, %v343_v61  ;;  %v360_v32 = vand.u32 2147483647, %v343_v61  ;;  %vm356_vm3 = vweird.f32 %v343_v61 }
 0x1a7   : > { %650 = vpow2.f32 %v622_v60 }
 0x1a8   : > { %v363_v39 = vor.u32 1.1754944e-38, %v362_v29  ;;  %vm361_vm5 = vcmp.eq.f32.partialorder %v360_v32, 8.507059e+37 }
 0x1a9   : > { %v307_v62 = vpop.f32.mrf.mxu2  ;;  %v316_v8 = vpop.f32.mrf.mxu3 }
 0x1aa   : > { %v645_v63 = vpop.eup %644  ;;  %v620_v3 = vmul.f32 -1.442695, %v307_v62  ;;  %v301_v5 = vpop.f32.mrf.mxu1  ;;  %v623_v25 = vmul.f32 -1.442695, %v316_v8 }
 0x1ab   : > { %v647_v15 = vpop.eup %646  ;;  %v802_v16 = vadd.f32 1.0, %v645_v63  ;;  %v618_v17 = vmul.f32 -1.442695, %v301_v5 }
 0x1ac   : > { %v649_v22 = vpop.eup %648  ;;  %v804_v23 = vadd.f32 1.0, %v647_v15  ;;  %652 = vpow2.f32 %v620_v3 }
 0x1ad   : > { %v651_v24 = vpop.eup %650  ;;  %654 = vrcp.f32 %v802_v16  ;;  %v352_v26 = vmul.f32 %v649_v22, %v343_v61  ;;  %vm357_vm2 = vweird.f32 %v649_v22  ;;  %v407_v48 = vand.u32 2147483648, %v802_v16 }
 0x1ae   : > { %656 = vrcp.f32 %v804_v23  ;;  %v808_v27 = vadd.f32 1.0, %v651_v24  ;;  %vm358_vm4 = vmor %vm356_vm3, %vm357_vm2  ;;  %v377_v50 = vand.u32 2147483648, %v804_v23  ;;  %v405_v54 = vand.u32 2147483647, %v802_v16 }
 0x1af   : > { %658 = vpow2.f32 %v618_v17  ;;  %v353_v28 = vsub.f32 1.0, %v352_v26  ;;  %v375_v56 = vand.u32 2147483647, %v804_v23  ;;  %vm401_vm8 = vweird.f32 %v802_v16 }
 0x1b0   : > { %660 = vpow2.f32 %v623_v25  ;;  %vm371_vm9 = vweird.f32 %v804_v23  ;;  %v408_v61 = vor.u32 1.1754944e-38, %v407_v48  ;;  %v378_v5 = vor.u32 1.1754944e-38, %v377_v50 }
 0x1b1   : > { %v310_v30 = vpop.f32.mrf.mxu2  ;;  %v354_v31 = vmul.f32 %v649_v22, %v353_v28  ;;  %662 = vrcp.f32 %v808_v27  ;;  %vm406_vm12 = vcmp.eq.f32.partialorder %v405_v54, 8.507059e+37  ;;  %vm376_vm13 = vcmp.eq.f32.partialorder %v375_v56, 8.507059e+37 }
 0x1b2   : > { %v653_v33 = vpop.eup %652  ;;  %v621_v34 = vmul.f32 -1.442695, %v310_v30  ;;  %vm446_vm0 = vweird.f32 %v808_v27 }
 0x1b3   : > { %v655_v35 = vpop.eup %654  ;;  %v811_v36 = vadd.f32 1.0, %v653_v33  ;;  %v355_v37 = vadd.f32 %v649_v22, %v354_v31 }
 0x1b4   : > { %v657_v38 = vpop.eup %656  ;;  %664 = vpow2.f32 %v621_v34  ;;  %v397_v40 = vmul.f32 %v655_v35, %v802_v16  ;;  %vm402_vm6 = vweird.f32 %v655_v35 }
 0x1b5   : > { %v659_v41 = vpop.eup %658  ;;  %666 = vrcp.f32 %v811_v36  ;;  %v359_v42 = vsel %vm358_vm4, %v649_v22, %v355_v37  ;;  %v367_v43 = vmul.f32 %v657_v38, %v804_v23  ;;  %vm372_vm7 = vweird.f32 %v657_v38  ;;  %vm403_vm10 = vmor %vm401_vm8, %vm402_vm6 }
 0x1b6   : > { %v816_v44 = vadd.f32 1.0, %v659_v41  ;;  %v364_v45 = vsel %vm361_vm5, %v363_v39, %v359_v42  ;;  %v398_v46 = vsub.f32 1.0, %v397_v40  ;;  %v661_v47 = vpop.eup %660  ;;  %vm373_vm11 = vmor %vm371_vm9, %vm372_vm7  ;;  %v422_v28 = vand.u32 2147483648, %v811_v36 }
 0x1b7   : > { %473 = vperm.xlu2 %639, %v364_v45   ;;  %v368_v49 = vsub.f32 1.0, %v367_v43  ;;  %v820_v51 = vpop.eup %662  ;;  %v823_v52 = vadd.f32 1.0, %v661_v47  ;;  %v420_v29 = vand.u32 2147483647, %v811_v36  ;;  %vm416_vm15 = vweird.f32 %v811_v36 }
 0x1b8   : > { %668 = vrcp.f32 %v816_v44  ;;  %v399_v53 = vmul.f32 %v655_v35, %v398_v46  ;;  %v442_v63 = vmul.f32 %v820_v51, %v808_v27  ;;  %v392_v33 = vand.u32 2147483648, %v816_v44 }
 0x1b9   : > { %v369_v55 = vmul.f32 %v657_v38, %v368_v49  ;;  %670 = vrcp.f32 %v823_v52  ;;  %v390_v37 = vand.u32 2147483647, %v816_v44  ;;  %v423_v40 = vor.u32 1.1754944e-38, %v422_v28 }
 0x1ba   : > { %v665_v57 = vpop.eup %664  ;;  %v400_v58 = vadd.f32 %v655_v35, %v399_v53  ;;  %v443_v25 = vsub.f32 1.0, %v442_v63  ;;  %vm386_vm3 = vweird.f32 %v816_v44  ;;  %vm421_vm4 = vcmp.eq.f32.partialorder %v420_v29, 8.507059e+37 }
 0x1bb   : > { %v667_v59 = vpop.eup %666  ;;  %v829_v60 = vadd.f32 1.0, %v665_v57  ;;  %v370_v62 = vadd.f32 %v657_v38, %v369_v55  ;;  %vm447_vm5 = vweird.f32 %v820_v51  ;;  %v393_v45 = vor.u32 1.1754944e-38, %v392_v33 }
 0x1bc   : > { %v404_v3 = vsel %vm403_vm10, %v655_v35, %v400_v58  ;;  %v412_v8 = vmul.f32 %v667_v59, %v811_v36  ;;  %vm417_vm14 = vweird.f32 %v667_v59  ;;  %v452_v46 = vand.u32 2147483648, %v808_v27  ;;  %vm853_vm8 = vmor %vm446_vm0, %vm447_vm5 }
 0x1bd   : > { %672 = vrcp.f32 %v829_v60  ;;  %v374_v15 = vsel %vm373_vm11, %v657_v38, %v370_v62  ;;  %v409_v17 = vsel %vm406_vm12, %v408_v61, %v404_v3  ;;  %vm418_vm1 = vmor %vm416_vm15, %vm417_vm14  ;;  %v444_v38 = vmul.f32 %v820_v51, %v443_v25 }
 0x1be   : > { %v669_v16 = vpop.eup %668  ;;  %v379_v22 = vsel %vm376_vm13, %v378_v5, %v374_v15  ;;  %v413_v23 = vsub.f32 1.0, %v412_v8  ;;  %vm391_vm7 = vcmp.eq.f32.partialorder %v390_v37, 8.507059e+37  ;;  %v453_v56 = vor.u32 1.1754944e-38, %v452_v46 }
 0x1bf   : > { %488 = vperm.xlu2 %639, %v409_v17   ;;  %478 = vperm.xlu0 %640, %v379_v22   ;;  %v382_v24 = vmul.f32 %v669_v16, %v816_v44  ;;  %v671_v31 = vpop.eup %670  ;;  %vm387_vm2 = vweird.f32 %v669_v16  ;;  %v445_v49 = vadd.f32 %v820_v51, %v444_v38  ;;  %v450_v44 = vand.u32 2147483647, %v808_v27 }
 0x1c0   : > { %v414_v26 = vmul.f32 %v667_v59, %v413_v23  ;;  %v457_v42 = vmul.f32 %v671_v31, %v823_v52  ;;  %vm388_vm6 = vmor %vm386_vm3, %vm387_vm2  ;;  %v437_v58 = vand.u32 2147483648, %v829_v60  ;;  %vm431_vm11 = vweird.f32 %v829_v60 }
 0x1c1   : > { %v383_v30 = vsub.f32 1.0, %v382_v24  ;;  %vm451_vm10 = vcmp.eq.f32.partialorder %v450_v44, 8.507059e+37  ;;  %v435_v27 = vand.u32 2147483647, %v829_v60  ;;  %vm461_vm14 = vweird.f32 %v823_v52 }
 0x1c2   : > { %v415_v32 = vadd.f32 %v667_v59, %v414_v26  ;;  %v458_v55 = vsub.f32 1.0, %v457_v42  ;;  %v438_v3 = vor.u32 1.1754944e-38, %v437_v58  ;;  %vm462_vm15 = vweird.f32 %v671_v31 }
 0x1c3   : > { %v673_v34 = vpop.eup %672  ;;  %v384_v35 = vmul.f32 %v669_v16, %v383_v30  ;;  %vm436_vm13 = vcmp.eq.f32.partialorder %v435_v27, 8.507059e+37  ;;  %v467_v8 = vand.u32 2147483648, %v823_v52  ;;  %v465_v15 = vand.u32 2147483647, %v823_v52  ;;  %vm463_vm0 = vmor %vm461_vm14, %vm462_vm15 }
 0x1c4   : > { %v419_v39 = vsel %vm418_vm1, %v667_v59, %v415_v32  ;;  %v427_v41 = vmul.f32 %v673_v34, %v829_v60  ;;  %vm432_vm9 = vweird.f32 %v673_v34  ;;  %v449_v59 = vsel %vm853_vm8, %v820_v51, %v445_v49 }
 0x1c5   : > { %v385_v36 = vadd.f32 %v669_v16, %v384_v35  ;;  %v424_v43 = vsel %vm421_vm4, %v423_v40, %v419_v39  ;;  %vm433_vm12 = vmor %vm431_vm11, %vm432_vm9  ;;  %v459_v62 = vmul.f32 %v671_v31, %v458_v55  ;;  %v454_v63 = vsel %vm451_vm10, %v453_v56, %v449_v59 }
 0x1c6   : > { %v428_v47 = vsub.f32 1.0, %v427_v41  ;;  %v468_v60 = vor.u32 1.1754944e-38, %v467_v8  ;;  %vm466_vm1 = vcmp.eq.f32.partialorder %v465_v15, 8.507059e+37 }
 0x1c7   : > { %493 = vperm.xlu2 %639, %v424_v43   ;;  %v389_v48 = vsel %vm388_vm6, %v669_v16, %v385_v36  ;;  %v460_v51 = vadd.f32 %v671_v31, %v459_v62 }
 0x1c8   : > { %v394_v50 = vsel %vm391_vm7, %v393_v45, %v389_v48  ;;  %v429_v54 = vmul.f32 %v673_v34, %v428_v47 }
 0x1c9   : > { %483 = vperm.xlu1 %641, %v394_v50   ;;  %v464_v16 = vsel %vm463_vm0, %v671_v31, %v460_v51 }
 0x1ca   : > { %v430_v57 = vadd.f32 %v673_v34, %v429_v54  ;;  %v469_v17 = vsel %vm466_vm1, %v468_v60, %v464_v16 }
 0x1cc   : > { %v434_v61 = vsel %vm433_vm12, %v673_v34, %v430_v57 }
 0x1cd   : > { %v439_v5 = vsel %vm436_vm13, %v438_v3, %v434_v61 }
 0x1cf   : > { %503 = vperm.xlu2 %639, %v454_v63  }
 0x1d1   : > { %498 = vperm.xlu1 %641, %v439_v5  }
 0x1d9   : > { %508 = vperm.xlu1 %641, %v469_v17  }
 0x211   : > { %v474_v22 = vpop.permute.xlu2 %473 }
 0x212   : > { %v511_v52 = vmul.f32 %v474_v22, %v759_v20  ;;  %v512_v23 = vmul.f32 %v474_v22, %v761_v21 }
 0x214   : > { %527 = vst [vmem:[%s871_s11] sm:$0xff] %v511_v52 }
 0x215   : > { %528 = vst [vmem:[%s871_s11 + $0x8] sm:$0xff] %v512_v23 }
 0x219   : > { %v489_v24 = vpop.permute.xlu2 %488 }
 0x21a   : > { %v517_v25 = vmul.f32 %v489_v24, %v731_v6  ;;  %v518_v26 = vmul.f32 %v489_v24, %v733_v7 }
 0x21c   : > { %533 = vst [vmem:[%s871_s11 + $0x30] sm:$0xff] %v517_v25 }
 0x21d   : > { %534 = vst [vmem:[%s871_s11 + $0x38] sm:$0xff] %v518_v26 }
 0x221   : > { %v494_v28 = vpop.permute.xlu2 %493 }
 0x222   : > { %v519_v29 = vmul.f32 %v494_v28, %v741_v11  ;;  %v520_v20 = vmul.f32 %v494_v28, %v743_v12 }
 0x224   : > { %535 = vst [vmem:[%s871_s11 + $0x40] sm:$0xff] %v519_v29 }
 0x225   : > { %536 = vst [vmem:[%s871_s11 + $0x48] sm:$0xff] %v520_v20 }
 0x229   : > { %v504_v21 = vpop.permute.xlu2 %503 }
 0x22a   : > { %v523_v30 = vmul.f32 %v504_v21, %v737_v9  ;;  %v524_v6 = vmul.f32 %v504_v21, %v739_v10 }
 0x22c   : > { %539 = vst [vmem:[%s871_s11 + $0x60] sm:$0xff] %v523_v30 }
 0x22d   : > { %540 = vst [vmem:[%s871_s11 + $0x68] sm:$0xff] %v524_v6 }
 0x231   : > { %v479_v7 = vpop.permute.xlu0 %478 }
 0x232   : > { %v513_v31 = vmul.f32 %v479_v7, %v755_v18  ;;  %v514_v11 = vmul.f32 %v479_v7, %v757_v19 }
 0x234   : > { %529 = vst [vmem:[%s871_s11 + $0x10] sm:$0xff] %v513_v31 }
 0x235   : > { %530 = vst [vmem:[%s871_s11 + $0x18] sm:$0xff] %v514_v11 }
 0x23b   : > { %v484_v12 = vpop.permute.xlu1 %483 }
 0x23c   : > { %v515_v32 = vmul.f32 %v484_v12, %v745_v13  ;;  %v516_v9 = vmul.f32 %v484_v12, %v747_v14 }
 0x23e   : > { %531 = vst [vmem:[%s871_s11 + $0x20] sm:$0xff] %v515_v32 }
 0x23f   : > { %532 = vst [vmem:[%s871_s11 + $0x28] sm:$0xff] %v516_v9 }
 0x243   : > { %v499_v10 = vpop.permute.xlu1 %498 }
 0x244   : > { %v521_v33 = vmul.f32 %v499_v10, %v723_v2  ;;  %v522_v34 = vmul.f32 %v499_v10, %v727_v4 }
 0x246   : > { %537 = vst [vmem:[%s871_s11 + $0x50] sm:$0xff] %v521_v33 }
 0x247   : > { %538 = vst [vmem:[%s871_s11 + $0x58] sm:$0xff] %v522_v34 }
 0x24b   : > { %v509_v18 = vpop.permute.xlu1 %508 }
 0x24c   : > { %v525_v19 = vmul.f32 %v509_v18, %v719_v0  ;;  %v526_v35 = vmul.f32 %v509_v18, %v721_v1 }
 0x24e   : > { %541 = vst [vmem:[%s871_s11 + $0x70] sm:$0xff] %v525_v19 }
 0x24f   : > { %542 = vst [vmem:[%s871_s11 + $0x78] sm:$0xff] %v526_v35 }
 0x250 PF: > { %s13_s12 = sadd.s32 1, %s680_s12  }
 0x251   : > { %p10_p4 = scmp.ge.s32.totalorder %s13_s12, 4  }
 0x253   :  { %12 = sbr.rel (!%p10_p4) target bundleno = 1 (0x1), region = 62 }

</bundles_post_ra>
